<compile_context>
chip_gen: v7x
topology: tpu7x:2x2x1
jax: 0.10.0
libtpu: 0.0.40
codegen_flags: <defaults>
</compile_context>

<pallas_src>
import jax
import jax.numpy as jnp
from jax.experimental import pallas as pl
from jax.experimental.pallas import tpu as pltpu


def _round_up(x, m):
    return (x + m - 1) // m * m


def _patch_embed_matmul_kernel(x_ref, w_ref, b_ref, o_ref):
    # x_ref: (TM, Kp) streamed patches   w_ref: (Kp, Dp) resident weight
    # b_ref: (1, Dp) resident f32 bias   o_ref: (TM, Dp) streamed output
    acc = jnp.dot(x_ref[...], w_ref[...], preferred_element_type=jnp.float32)
    o_ref[...] = (acc + b_ref[...]).astype(o_ref.dtype)


def prepare_patch_embed_params(weight, bias, compute_dtype=None):
    """Hoisted, per-module-init parameter prep.

    weight: (D, C, ph, pw)  (PyTorch Conv2d layout).  bias: (D,).
    Returns (w_mat, b_mat) where w_mat is (Kp, Dp) lane-padded (optionally
    cast to `compute_dtype` for the MXU) and b_mat is (1, Dp) float32.
    """
    D, C, ph, pw = weight.shape
    K = C * ph * pw
    Kp = _round_up(K, 128)
    Dp = _round_up(D, 128)

    w_mat = jnp.transpose(weight.reshape(D, K))            # (K, D), lane-major D
    if compute_dtype is not None:
        w_mat = w_mat.astype(compute_dtype)
    if (Kp, Dp) != (K, D):
        w_mat = jnp.pad(w_mat, ((0, Kp - K), (0, Dp - D)))

    b_mat = bias.astype(jnp.float32)
    if Dp != D:
        b_mat = jnp.pad(b_mat, (0, Dp - D))
    b_mat = b_mat.reshape(1, Dp)
    return w_mat, b_mat


def patch_embed_forward(x, w_mat, b_mat, patch_size, embed_dim, *,
                        tm=512, compute_dtype=None, out_dtype=None):
    """x: (B, C, H, W) NCHW.  w_mat/b_mat from prepare_patch_embed_params.
    Returns (B, num_patches, embed_dim)."""
    B, C, H, W = x.shape
    ph, pw = patch_size
    assert H % ph == 0 and W % pw == 0
    nH, nW = H // ph, W // pw
    N = nH * nW
    K = C * ph * pw
    Kp, Dp = w_mat.shape
    D = embed_dim
    M = B * N
    out_dtype = out_dtype or x.dtype

    # --- glue: extract non-overlapping patches, flattened (C, ph, pw) per
    # patch to match the conv-weight flattening.
    # TODO(synk): fuse this strided rearrange into the kernel (one image /
    # patch-row per grid step + in-kernel reshuffle) to drop the extra HBM
    # round trip of the input; kept in XLA here for lowering robustness.
    patches = x.reshape(B, C, nH, ph, nW, pw)
    patches = patches.transpose(0, 2, 4, 1, 3, 5).reshape(M, K)
    if compute_dtype is not None:
        patches = patches.astype(compute_dtype)

    # Tile sizing: multiple of the sublane packing (8 f32 / 16 bf16), capped
    # at the (rounded-up) problem size so tiny inputs don't over-pad.
    sub = 16 if patches.dtype == jnp.bfloat16 else 8
    tm = max(sub, min(_round_up(tm, sub), _round_up(M, sub)))
    Mp = _round_up(M, tm)

    if (Mp, Kp) != (M, K):
        patches = jnp.pad(patches, ((0, Mp - M), (0, Kp - K)))

    grid = (Mp // tm,)
    out = pl.pallas_call(
        _patch_embed_matmul_kernel,
        out_shape=jax.ShapeDtypeStruct((Mp, Dp), out_dtype),
        grid_spec=pltpu.PrefetchScalarGridSpec(
            num_scalar_prefetch=0,
            grid=grid,
            in_specs=[
                pl.BlockSpec((tm, Kp), lambda i: (i, 0)),   # streamed patches
                pl.BlockSpec((Kp, Dp), lambda i: (0, 0)),   # resident weight
                pl.BlockSpec((1, Dp), lambda i: (0, 0)),    # resident f32 bias
            ],
            out_specs=pl.BlockSpec((tm, Dp), lambda i: (i, 0)),
        ),
        compiler_params=pltpu.CompilerParams(
            # No reduction axis in the grid -> M tiles are independent; lets
            # v7x shard them across its two TensorCores.
            dimension_semantics=("parallel",)),
    )(patches, w_mat, b_mat)

    return out[:M, :D].reshape(B, N, D)


if __name__ == "__main__":
    # Small, consistent shapes: img 16x16, patch 4x4, 4 in channels, 32 embed dim.
    B, C, H, W = 2, 4, 16, 16
    ph, pw = 4, 4
    D = 32

    key = jax.random.PRNGKey(0)
    kx, kw, kb = jax.random.split(key, 3)
    x = jax.random.normal(kx, (B, C, H, W), dtype=jnp.float32)
    # Deterministic synthetic parameters (Conv2d weight layout: (D, C, ph, pw)).
    weight = jax.random.normal(kw, (D, C, ph, pw), dtype=jnp.float32) * 0.02
    bias = jax.random.normal(kb, (D,), dtype=jnp.float32) * 0.02

    # Reference: XLA conv with stride == kernel (same semantics as nn.Conv2d).
    ref = jax.lax.conv_general_dilated(
        x, weight, window_strides=(ph, pw), padding="VALID",
        dimension_numbers=("NCHW", "OIHW", "NCHW"))
    ref = ref + bias.reshape(1, D, 1, 1)
    ref = ref.reshape(B, D, -1).transpose(0, 2, 1)   # flatten(2).transpose(1,2)

    # f32 path; tm=16 forces a multi-step grid even at these tiny shapes so the
    # tiled/pipelined path is exercised.
    w32, b32 = prepare_patch_embed_params(weight, bias)
    out32 = patch_embed_forward(x, w32, b32, (ph, pw), D, tm=16)
    out32 = jax.block_until_ready(out32)
    assert out32.shape == (B, (H // ph) * (W // pw), D)
    assert jnp.allclose(out32, ref, atol=1e-4, rtol=1e-4)

    # bf16 MXU-input path (f32 accumulation + f32 bias epilogue), default tm.
    wbf, bbf = prepare_patch_embed_params(weight, bias, compute_dtype=jnp.bfloat16)
    outbf = patch_embed_forward(x, wbf, bbf, (ph, pw), D,
                                compute_dtype=jnp.bfloat16)
    outbf = jax.block_until_ready(outbf)
    assert outbf.shape == (B, (H // ph) * (W // pw), D)
    assert jnp.allclose(outbf, ref, atol=2e-2, rtol=2e-2)

    print("KERNEL_OK")
</pallas_src>

<mosaic_0001>
module attributes {stable_mosaic.version = 11 : i64} {
  func.func @_patch_embed_matmul_kernel(%arg0: i32, %arg1: memref<16x128xf32, #tpu.memory_space<vmem>>, %arg2: memref<128x128xf32, #tpu.memory_space<vmem>>, %arg3: memref<1x128xf32, #tpu.memory_space<vmem>>, %arg4: memref<16x128xf32, #tpu.memory_space<vmem>>) attributes {dimension_semantics = [#tpu.dimension_semantics<parallel>], iteration_bounds = array<i64: 2>, scalar_prefetch = 0 : i64, scratch_operands = 0 : i64, tpu.core_type = #tpu.core_type<tc>, window_params = [{transform_indices = @transform_0, window_bounds = array<i64: 16, 128>}, {pipeline_mode = #tpu.pipeline_mode<synchronous>, transform_indices = @transform_1, window_bounds = array<i64: 128, 128>}, {pipeline_mode = #tpu.pipeline_mode<synchronous>, transform_indices = @transform_2, window_bounds = array<i64: 1, 128>}, {transform_indices = @transform_3, window_bounds = array<i64: 16, 128>}]} {
    %c0 = arith.constant 0 : index
    %c0_0 = arith.constant 0 : index
    %0 = vector.load %arg1[%c0, %c0_0] : memref<16x128xf32, #tpu.memory_space<vmem>>, vector<16x128xf32>
    %c0_1 = arith.constant 0 : index
    %c0_2 = arith.constant 0 : index
    %1 = vector.load %arg2[%c0_1, %c0_2] : memref<128x128xf32, #tpu.memory_space<vmem>>, vector<128x128xf32>
    %cst = arith.constant dense<0.000000e+00> : vector<16x128xf32>
    %2 = tpu.matmul %0, %1, %cst {dimension_numbers = #tpu.dot_dimension_numbers<[1], [0], [0], [1], [0, 0, 1, 1], [], []>} : vector<16x128xf32>, vector<128x128xf32>, vector<16x128xf32> -> vector<16x128xf32>
    %c0_3 = arith.constant 0 : index
    %c0_4 = arith.constant 0 : index
    %3 = vector.load %arg3[%c0_3, %c0_4] : memref<1x128xf32, #tpu.memory_space<vmem>>, vector<1x128xf32>
    %4 = vector.broadcast %3 : vector<1x128xf32> to vector<16x128xf32>
    %5 = arith.addf %2, %4 : vector<16x128xf32>
    %c0_5 = arith.constant 0 : index
    %c0_6 = arith.constant 0 : index
    %6 = vector.load %arg4[%c0_5, %c0_6] : memref<16x128xf32, #tpu.memory_space<vmem>>, vector<16x128xf32>
    tpu.vector_store %arg4[%c0_5, %c0_6], %5 {strides = array<i32>} : memref<16x128xf32, #tpu.memory_space<vmem>>, vector<16x128xf32>,
    return
  }
  func.func @transform_0(%arg0: i32) -> (i32, i32) {
    %c0_i32 = arith.constant 0 : i32
    %c0_i32_0 = arith.constant 0 : i32
    return %arg0, %c0_i32 : i32, i32
  }
  func.func @transform_1(%arg0: i32) -> (i32, i32) {
    %c0_i32 = arith.constant 0 : i32
    %c0_i32_0 = arith.constant 0 : i32
    %c0_i32_1 = arith.constant 0 : i32
    return %c0_i32, %c0_i32_0 : i32, i32
  }
  func.func @transform_2(%arg0: i32) -> (i32, i32) {
    %c0_i32 = arith.constant 0 : i32
    %c0_i32_0 = arith.constant 0 : i32
    %c0_i32_1 = arith.constant 0 : i32
    return %c0_i32, %c0_i32_0 : i32, i32
  }
  func.func @transform_3(%arg0: i32) -> (i32, i32) {
    %c0_i32 = arith.constant 0 : i32
    %c0_i32_0 = arith.constant 0 : i32
    return %arg0, %c0_i32 : i32, i32
  }
}

</mosaic_0001>

<bundles_post_ra>
// kernel: tpu_custom_call.1
= control target key start
LH: loop header
LB: loop body
LE: loop exit
PB: predicated region body
PF: predicated region fallthrough
CT: control target
= control target key end

     0   :  { %8 = vsyncpa [#allocation3], 0  ;;  %s945_s0 = inlined_call_operand.hbm [shape: f32[32,128], index: 0, kind: input, shape index: {}]   ;;  %s946_s1 = inlined_call_operand.hbm [shape: f32[128,128], index: 1, kind: input, shape index: {}]   ;;  %s947_s2 = inlined_call_operand.vmem [shape: f32[1,128], index: 2, kind: input, shape index: {}]   ;;  %s948_s3 = inlined_call_operand.hbm [shape: f32[32,128], index: 3, kind: output, shape index: {}]  }
   0x1   :  { %10 = vsyncpa [#allocation3 + $0x1], 0 }
   0x2   :  { %11 = vsyncpa [#allocation6], 0 }
   0x3   :  { %12 = vsyncpa [#allocation4], 0 }
   0x4   :  { %14 = vsyncpa [#allocation4 + $0x1], 0  ;;  %s727_s12 = smov 0   ;;  %s729_s13 = smov 0  }
   0x5   :  { %s731_s14 = smov 0   ;;  %s733_s15 = smov 0  }
   0x6 LB: > { %s748_s16 = sadd.s32 4294967295, %s698_s15   ;;  %s405_s17 = sadd.s32 4294967294, %s698_s15   ;;  %s698_s15 = sphi %s733_s15, %s968_s15   ;;  %s694_s14 = sphi %s731_s14, %s967_s14   ;;  %s690_s13 = sphi %s729_s13, %s966_s13   ;;  %s686_s12 = sphi %s727_s12, %s965_s12  }
   0x7   : > { %p40_p0 = scmp.ne.s32.totalorder %s690_s13, %s686_s12  ;;  %p949_p1 = scmp.eq.s32.totalorder %s748_s16, 0 }
   0x8   : > { %p112_p3 = scmp.eq.s32.totalorder %s405_s17, 1  ;;  %p406_p5 = scmp.ge.s32.totalorder %s698_s15, 1 }
   0x9   : > { %p757_p4 = por %p949_p1, %p40_p0  ;;  %p119_p7 = scmp.lt.s32.totalorder %s698_s15, 3 }
   0xa   : > { %p762_p6 = por %p112_p3, %p40_p0  ;;  %s700_s21 = smov [#allocation5]  }
   0xb   : > { %s952_s18 = scalar_select %p757_p4, 1, 0 }
   0xc   : > { %s953_s19 = scalar_select %p762_p6, 1, 0 }
   0xd   : > { %p767_p8 = pnand %p406_p5, %p119_p7  ;;  %s131_s22 = sshll.u32 %s700_s21, 4  ;;  %s771_s22 = int_to_ptr.vmem [resolvable:$true] %s131_s22 }
   0xe   : > { %s783_s24 = sadd.s32 1, %s698_s15   ;;  %s27_s25 = sadd.s32 1, %s694_s14 }
   0xf   : > { %s954_s20 = scalar_select %p767_p8, 1, 0 }
  0x10   : > { %p517_p9 = pneg %p767_p8  ;;  %s24_s26 = ssub.s32 %s698_s15, %s783_s24 }
  0x11   : > { %s570_s29 = scalar_lea.hbm %s946_s1, 2048 }
  0x12   : > { %p778_p11 = pnand %p517_p9, %p949_p1  ;;  %p571_p12 = scmp.ne.s32.totalorder %s946_s1, %s570_s29 }
  0x13   : > { %p577_p5 = scmp.lt.u32.totalorder %s570_s29, %s946_s1 }
  0x14   : > { %p572_p13 = pneg %p778_p11 }
  0x16   : > { %p573_p0 = pnand %p572_p13, %p571_p12 }
  0x18   : > { %p574_p3 = pneg %p573_p0 }
  0x1a   : > { %p579_p7 = pnand %p577_p5, %p574_p3 }
  0x1c   : > { %582 = shalt.err (!%p579_p7)
}
  0x1d   : > { %s583_s7 = scalar_lea.vmem %s771_s22, 2048  ;;  %p591_p2 = scmp.lt.s32.totalorder %s771_s22, %s771_s22 }
  0x1e   : > { %p584_p9 = scmp.ne.s32.totalorder %s771_s22, %s583_s7  ;;  %p592_p6 = scmp.lt.s32.totalorder %s583_s7, %s583_s7 }
  0x20   : > { %p586_p10 = pnand %p584_p9, %p572_p13  ;;  %p593_p4 = por %p592_p6, %p591_p2 }
  0x22   : > { %p587_p1 = pneg %p586_p10 }
  0x24   : > { %p594_p8 = pnand %p593_p4, %p587_p1 }
  0x26   : > { %597 = shalt.err (!%p594_p8)
}
  0x27   : > { %s701_s8 = smov 128   ;;  %s702_s9 = smov 8  }
  0x28   : > { %520 = dma.hbm_to_vmem [thread:$0]  (!%p778_p11), %s946_s1, 2048, %s771_s22, [#allocation6], %s701_s8, %s701_s8, %s702_s9  }
  0x29   : > { %p25_p1 = scmp.eq.s32.totalorder %s24_s26, 0  ;;  %p34_p2 = scmp.ne.s32.totalorder %s694_s14, %s690_s13 }
  0x2a   : > { %p35_p4 = scmp.eq.s32.totalorder %s698_s15, 0  ;;  %p530_p6 = scmp.lt.s32.totalorder %s698_s15, 2 }
  0x2b   : > { %s817_s17 = scalar_select %p25_p1, %s694_s14, %s27_s25  }
  0x2c   : > { %p36_p8 = por %p35_p4, %p34_p2  ;;  %p956_p10 = scmp.eq.s32.totalorder %s748_s16, 1 }
  0x2d   : > { %s148_s23 = sand.u32 1, %s694_s14   ;;  %s422_s27 = sshll.u32 %s698_s15, 8 }
  0x2e   : > { %p821_p12 = por %p956_p10, %p34_p2  ;;  %s409_s28 = sshll.u32 %s148_s23, 4 }
  0x2f   : > { %s830_s4 = scalar_lea.hbm %s945_s0, %s422_s27  ;;  %s152_s22 = scalar_lea.vmem [#allocation2], %s409_s28 }
  0x30   : > { %s159_s25 = sshll.u32 %s152_s22, 4  ;;  %p832_p11 = pnand %p530_p6, %p36_p8  ;;  %s836_s25 = int_to_ptr.vmem [resolvable:$true] %s159_s25 }
  0x31   : > { %s838_s5 = scalar_lea.sflag [#allocation3], %s148_s23  ;;  %s598_s6 = scalar_lea.hbm %s830_s4, 256 }
  0x32   : > { %p599_p13 = scmp.ne.s32.totalorder %s830_s4, %s598_s6  ;;  %p600_p0 = pneg %p832_p11 }
  0x33   : > { %s603_s11 = scalar_lea.hbm %s945_s0, 512  ;;  %p604_p7 = scmp.lt.u32.totalorder %s830_s4, %s945_s0 }
  0x34   : > { %p601_p3 = pnand %p600_p0, %p599_p13  ;;  %p605_p9 = scmp.lt.u32.totalorder %s603_s11, %s598_s6 }
  0x35   : > { %p607_p2 = scmp.lt.u32.totalorder %s598_s6, %s830_s4 }
  0x36   : > { %p602_p5 = pneg %p601_p3  ;;  %p606_p1 = por %p605_p9, %p604_p7 }
  0x38   : > { %p608_p4 = por %p607_p2, %p606_p1 }
  0x3a   : > { %p609_p6 = pnand %p608_p4, %p602_p5 }
  0x3c   : > { %612 = shalt.err (!%p609_p6)
}
  0x3d   : > { %s613_s23 = scalar_lea.vmem %s836_s25, 256  ;;  %s703_s29 = smov [#allocation2]  }
  0x3e   : > { %p614_p8 = scmp.ne.s32.totalorder %s836_s25, %s613_s23  ;;  %s618_s30 = sshll.u32 %s703_s29, 4  ;;  %s619_s30 = int_to_ptr.vmem [resolvable:$false] %s618_s30 }
  0x3f   : > { %s620_s22 = scalar_lea.vmem %s619_s30, 512  ;;  %p621_p3 = scmp.lt.s32.totalorder %s836_s25, %s619_s30 }
  0x40   : > { %p616_p10 = pnand %p614_p8, %p600_p0  ;;  %p622_p7 = scmp.lt.s32.totalorder %s620_s22, %s613_s23 }
  0x42   : > { %p617_p13 = pneg %p616_p10  ;;  %p623_p9 = por %p622_p7, %p621_p3 }
  0x44   : > { %p624_p1 = pnand %p623_p9, %p617_p13 }
  0x46   : > { %627 = shalt.err (!%p624_p1)
}
  0x47   : > { %524 = dma.hbm_to_vmem [thread:$0]  (!%p832_p11), %s830_s4, 256, %s836_s25, %s838_s5, %s701_s8, %s701_s8, %s702_s9  }
  0x48   : > { %p959_p0 = scmp.ne.s32.totalorder %s954_s20, 0 }
  0x49   : > { %s872_s6 = sand.u32 (!%p959_p0), 1, %s690_s13   ;;  %p960_p5 = scmp.ne.s32.totalorder (!%p959_p0), %s952_s18, 0 }
  0x4a   : > { %171 = sbr.rel (%p959_p0) target bundleno = 350 (0x15e), region = 32  ;;  %s413_s7 = sshll.u32 (!%p959_p0), %s872_s6, 4 }
  0x4b   : > { %s174_s10 = scalar_lea.sflag (!%p959_p0), [#allocation3], %s872_s6  ;;  %s878_s26 = scalar_lea.vmem (!%p959_p0), [#allocation2], %s413_s7 }
  0x51   : > { %673 = dma.done.wait (%p960_p5), %s174_s10, 256  }
  0x52   : > { %675 = vsyncadd (%p960_p5), %s174_s10, 4294967040  ;;  %p961_p11 = scmp.eq.s32.totalorder %s748_s16, 0 }
  0x54   : > { %677 = dma.done.wait (%p961_p11), [#allocation6], 2048   ;;  %p962_p2 = pmov %p961_p11 }
  0x55   : > { %v208_v0 = vld [vmem:[#allocation5] sm:$0xff]  ;;  %v209_v1 = vld [vmem:[#allocation5 + $0x8] sm:$0xff]  ;;  %v210_v2 = vld [vmem:[#allocation5 + $0x10] sm:$0xff]  ;;  %s203_s18 = scalar_lea.vmem [#allocation7], %s413_s7  ;;  %s423_s4 = sshll.u32 %s748_s16, 8 }
  0x56   : > { %679 = vsyncadd (%p962_p2), [#allocation6], 4294965248  ;;  %v477_v3 = vpack.c.bf16 %v209_v1, %v208_v0  ;;  %v211_v4 = vld [vmem:[#allocation5 + $0x18] sm:$0xff]  ;;  %v212_v6 = vld [vmem:[#allocation5 + $0x20] sm:$0xff]  ;;  %s322_s20 = sshll.u32 %s203_s18, 4  ;;  %s901_s11 = scalar_lea.hbm %s948_s3, %s423_s4  ;;  %s896_s20 = int_to_ptr.vmem [resolvable:$true] %s322_s20 }
  0x57   : > { %v481_v5 = vpack.c.bf16 %v211_v4, %v210_v2  ;;  %v213_v7 = vld [vmem:[#allocation5 + $0x28] sm:$0xff]  ;;  %v206_v9 = vld [vmem:[%s878_s26] sm:$0xff]  ;;  %v215_v11 = vld [vmem:[#allocation5 + $0x38] sm:$0xff]  ;;  %s309_s27 = scalar_lea.sflag [#allocation4], %s872_s6  ;;  %s628_s28 = scalar_lea.vmem %s896_s20, 256 }
  0x58   : > { %478 = vmatprep.subr.bf16.mxu0 %v477_v3  ;;  %v485_v8 = vpack.c.bf16 %v213_v7, %v212_v6  ;;  %v214_v10 = vld [vmem:[#allocation5 + $0x30] sm:$0xff]  ;;  %474 = vmatprep.mubr.f32.mxu0 %v206_v9  ;;  %v216_v13 = vld [vmem:[#allocation5 + $0x40] sm:$0xff]  ;;  %v217_v14 = vld [vmem:[#allocation5 + $0x48] sm:$0xff]  ;;  %p629_p4 = scmp.ne.s32.totalorder %s896_s20, %s628_s28  ;;  %s704_s16 = smov [#allocation7]  }
  0x59   : > { %480 = vmatpush3.bf16.msra.mxu0 %v477_v3  ;;  %v489_v12 = vpack.c.bf16 %v215_v11, %v214_v10  ;;  %v493_v15 = vpack.c.bf16 %v217_v14, %v216_v13  ;;  %v218_v16 = vld [vmem:[#allocation5 + $0x50] sm:$0xff]  ;;  %v219_v17 = vld [vmem:[#allocation5 + $0x58] sm:$0xff]  ;;  %v220_v19 = vld [vmem:[#allocation5 + $0x60] sm:$0xff]  ;;  %s632_s23 = sshll.u32 %s704_s16, 4  ;;  %s633_s23 = int_to_ptr.vmem [resolvable:$false] %s632_s23 }
  0x5a   : > { %482 = vmatprep.subr.bf16.mxu0 %v481_v5  ;;  %v497_v18 = vpack.c.bf16 %v219_v17, %v218_v16  ;;  %v221_v20 = vld [vmem:[#allocation5 + $0x68] sm:$0xff]  ;;  %v222_v22 = vld [vmem:[#allocation5 + $0x70] sm:$0xff]  ;;  %v223_v23 = vld [vmem:[#allocation5 + $0x78] sm:$0xff]  ;;  %p630_p6 = pnand %p629_p4, %p821_p12  ;;  %s634_s29 = scalar_lea.vmem %s633_s23, 512 }
  0x5b   : > { %v501_v21 = vpack.c.bf16 %v221_v20, %v220_v19  ;;  %v505_v24 = vpack.c.bf16 %v223_v23, %v222_v22  ;;  %v207_v25 = vld [vmem:[%s878_s26 + $0x8] sm:$0xff]  ;;  %v416_v26 = vld [vmem:[%s947_s2] ss:$0 sm:$0xff]  ;;  %p635_p10 = scmp.lt.s32.totalorder %s896_s20, %s633_s23  ;;  %p636_p13 = scmp.lt.s32.totalorder %s634_s29, %s628_s28 }
  0x5c   : > { %p631_p8 = pneg %p630_p6 }
  0x5d   : > { %484 = vmatpush3.bf16.msra.mxu0 %v481_v5  ;;  %p637_p3 = por %p636_p13, %p635_p10 }
  0x5e   : > { %486 = vmatprep.subr.bf16.mxu0 %v485_v8 }
  0x5f   : > { %p638_p7 = pnand %p637_p3, %p631_p8 }
  0x61   : > { %488 = vmatpush3.bf16.msra.mxu0 %v485_v8 }
  0x62   : > { %490 = vmatprep.subr.bf16.mxu0 %v489_v12 }
  0x65   : > { %492 = vmatpush3.bf16.msra.mxu0 %v489_v12 }
  0x66   : > { %494 = vmatprep.subr.bf16.mxu0 %v493_v15 }
  0x69   : > { %496 = vmatpush3.bf16.msra.mxu0 %v493_v15 }
  0x6a   : > { %498 = vmatprep.subr.bf16.mxu0 %v497_v18 }
  0x6d   : > { %500 = vmatpush3.bf16.msra.mxu0 %v497_v18 }
  0x6e   : > { %502 = vmatprep.subr.bf16.mxu0 %v501_v21 }
  0x71   : > { %504 = vmatpush3.bf16.msra.mxu0 %v501_v21 }
  0x72   : > { %506 = vmatprep.subr.bf16.mxu0 %v505_v24 }
  0x75   : > { %508 = vmatpush3.bf16.msra.mxu0 %v505_v24 }
  0x78   : > { %475 = vmatmul.mubr.f32.vlgmr.msra.gmra.mrb[0].mxu0 %v207_v25 }
 0x14b   : > { %v476_v27 = vpop.f32.mrb[0].mxu0 }
 0x14c   : > { %v303_v28 = vadd.f32 %v476_v27, %v416_v26  ;;  %v297_v29 = vpop.f32.mrb[1].mxu0 }
 0x14d   : > { %v298_v30 = vadd.f32 %v416_v26, %v297_v29 }
 0x14e   : > { %307 = vst [vmem:[%s203_s18 + $0x8] sm:$0xff] %v303_v28 }
 0x14f   : > { %306 = vst [vmem:[%s203_s18] sm:$0xff] %v298_v30 }
 0x150   : > { %641 = shalt.err (!%p638_p7)
}
 0x151   : > { %s642_s30 = scalar_lea.hbm %s901_s11, 256  ;;  %s646_s10 = scalar_lea.hbm %s948_s3, 512 }
 0x152   : > { %p643_p9 = scmp.ne.s32.totalorder %s901_s11, %s642_s30  ;;  %p647_p5 = scmp.lt.u32.totalorder %s901_s11, %s948_s3 }
 0x153   : > { %p648_p11 = scmp.lt.u32.totalorder %s646_s10, %s642_s30  ;;  %p650_p4 = scmp.lt.u32.totalorder %s642_s30, %s901_s11 }
 0x154   : > { %p644_p1 = pnand %p643_p9, %p821_p12 }
 0x155   : > { %p649_p2 = por %p648_p11, %p647_p5 }
 0x156   : > { %p645_p0 = pneg %p644_p1 }
 0x157   : > { %p651_p6 = por %p650_p4, %p649_p2 }
 0x159   : > { %p652_p8 = pnand %p651_p6, %p645_p0 }
 0x15b   : > { %655 = shalt.err (!%p652_p8)
}
 0x15c   : > { %s705_s8 = smov 128   ;;  %s706_s9 = smov 8  }
 0x15d   : > { %515 = dma.vmem_to_hbm [thread:$0]  (%p821_p12), %s896_s20, 256, %s901_s11, %s309_s27, %s705_s8, %s705_s8, %s706_s9  }
 0x15e PF: > { %s337_s4 = sand.u32 1, %s686_s12   ;;  %p963_p10 = scmp.ne.s32.totalorder %s953_s19, 0 }
 0x15f   : > { %p964_p13 = scmp.ge.s32.totalorder %s698_s15, 2  ;;  %s338_s25 = scalar_lea.sflag [#allocation4], %s337_s4 }
 0x161   : > { %p526_p3 = pnand %p964_p13, %p963_p10 }
 0x163   : > { %681 = dma.done.wait (!%p526_p3), %s338_s25, 256  }
 0x164   : > { %683 = vsyncadd (!%p526_p3), %s338_s25, 4294967040  ;;  %p17_p7 = scmp.ge.s32.totalorder %s783_s24, 4   ;;  %s965_s12 = smov %s690_s13 }
 0x165   : > { %s966_s13 = smov %s694_s14  ;;  %s967_s14 = smov %s817_s17 }
 0x166   : > { %s968_s15 = smov %s783_s24  ;;  %19 = sbr.rel (!%p17_p7) target bundleno = 6 (0x6), region = 81 }
 0x16d   :  { %343 = vsyncpa [#allocation3], 1 }
 0x16e   :  { %345 = vsyncpa [#allocation3 + $0x1], 1 }
 0x16f   :  { %346 = vsyncpa [#allocation6], 1 }
 0x170   :  { %347 = vsyncpa [#allocation4], 1 }
 0x171   :  { %349 = vsyncpa [#allocation4 + $0x1], 1 }

</bundles_post_ra>
